<compile_context>
chip_gen: v7x
topology: tpu7x:2x2x1
jax: 0.10.0
libtpu: 0.0.40
codegen_flags: <defaults>
</compile_context>

<pallas_src>
import jax
import jax.numpy as jnp
from jax.experimental import pallas as pl
from jax.experimental.pallas import tpu as pltpu


def _proj_kernel(w_ref, x_ref, o_ref):
    # w_ref: (K, C) resident weight; x_ref: (Bb, C, t_hw); o_ref: (Bb, K, t_hw).
    w = w_ref[...]
    for b in range(x_ref.shape[0]):  # Bb is a static block dim -> unrolled at trace time
        o_ref[b] = jnp.dot(
            w, x_ref[b], preferred_element_type=jnp.float32
        ).astype(o_ref.dtype)


def _weight_spec(K, C):
    """Constant-index weight spec; single resident buffer when Buffered(1) is available."""
    idx = lambda b, j: (0, 0)
    try:
        return pl.BlockSpec((K, C), idx, pipeline_mode=pl.Buffered(1))
    except (AttributeError, TypeError):
        return pl.BlockSpec((K, C), idx)


def _pick_hw_tile(hw, C, K, in_isz, out_isz, *, max_tile=2048,
                  vmem_block_budget=10 << 20):
    """Return (t_hw, grid_hw) with t_hw always a multiple of 128.

    t_hw is capped so the double-buffered in/out blocks for ONE batch element stay
    under `vmem_block_budget` (safe vs. the 16 MiB v5e scoped-VMEM default and the
    64 MiB/TC on v7x).  Non-128-multiple HW is handled via a masked edge tile.
    """
    per_lane_vmem = 2 * C * in_isz + 2 * K * out_isz   # double-buffered in + out
    cap = min(max_tile, vmem_block_budget // per_lane_vmem)
    cap = max(128, (cap // 128) * 128)                  # force a multiple of 128

    if hw <= cap:
        # Single (possibly padded / edge-masked) tile covering all of HW.
        t = ((hw + 127) // 128) * 128
        return t, 1

    # Largest exact divisor of hw that is a multiple of 128 and <= cap.
    best = 0
    for t in range(cap, 127, -128):
        if hw % t == 0:
            best = t
            break
    if best >= 512:
        return best, hw // best

    # No decent exact divisor (would land at 128/256 -> ~29-63% of roofline):
    # use a large tile with a masked last (edge) tile instead.
    return cap, -(-hw // cap)


def _pick_batch_block(B, grid_hw, C, K, t_hw, in_isz, out_isz, *,
                      vmem_block_budget=10 << 20, target_step_bytes=2 << 20):
    """Fuse batch elements into one block when per-step bytes are too small to
    amortize the ~0.35 us grid-step overhead (small feature maps)."""
    per_b_vmem = t_hw * (2 * C * in_isz + 2 * K * out_isz)
    per_b_move = t_hw * (C * in_isz + K * out_isz)
    divisors = [d for d in range(1, B + 1) if B % d == 0]

    bb = 1
    for d in divisors:
        if d * per_b_vmem > vmem_block_budget:
            break
        bb = d
        if bb * per_b_move >= target_step_bytes:
            break

    # Megacore (v7x has 2 TCs): prefer >= 2 grid steps, but only if the smaller block
    # still moves a reasonable amount per step.
    while bb > 1 and (B // bb) * grid_hw < 2:
        smaller = max(d for d in divisors if d < bb)
        if smaller * per_b_move < (256 << 10):
            break
        bb = smaller
    return bb


def spnet_classifier_forward(x_nchw, class_emb_kc, *, out_dtype=None, max_tile=2048):
    """x_nchw: (B, C, H, W); class_emb_kc: (K, C) (transpose of the torch Parameter,
    hoisted to init).  Returns (B, K, H, W) in `out_dtype` (default: x dtype)."""
    B, C, H, W = x_nchw.shape
    K, Cw = class_emb_kc.shape
    assert C == Cw, "channel dim of x must equal embedding dim"

    out_dtype = jnp.dtype(out_dtype) if out_dtype is not None else jnp.dtype(x_nchw.dtype)
    in_isz = jnp.dtype(x_nchw.dtype).itemsize
    out_isz = out_dtype.itemsize

    HW = H * W
    x_bchw = x_nchw.reshape(B, C, HW)              # free view, no data movement
    w_kc = class_emb_kc.astype(x_nchw.dtype)       # tiny (K*C); bf16 weight when x is bf16

    t_hw, grid_hw = _pick_hw_tile(HW, C, K, in_isz, out_isz, max_tile=max_tile)
    bb = _pick_batch_block(B, grid_hw, C, K, t_hw, in_isz, out_isz)
    grid = (B // bb, grid_hw)

    cost = pl.CostEstimate(
        flops=2 * B * K * C * HW,
        bytes_accessed=in_isz * (B * C * HW + K * C) + out_isz * B * K * HW,
        transcendentals=0,
    )

    out = pl.pallas_call(
        _proj_kernel,
        out_shape=jax.ShapeDtypeStruct((B, K, HW), out_dtype),
        grid=grid,
        in_specs=[
            # Weight: constant block index -> stays resident in VMEM.
            _weight_spec(K, C),
            # Activations: Bb fused batch rows, full C, one lane-dense HW tile.
            pl.BlockSpec((bb, C, t_hw), lambda b, j: (b, 0, j)),
        ],
        # Lane-dense output tile: last dim t_hw (multiple of 128), K on sublanes.
        out_specs=pl.BlockSpec((bb, K, t_hw), lambda b, j: (b, 0, j)),
        compiler_params=pltpu.CompilerParams(
            dimension_semantics=("parallel", "parallel"),
        ),
        cost_estimate=cost,
    )(w_kc, x_bchw)

    return out.reshape(B, K, H, W)  # free view, already NCHW


def make_class_emb(key, num_classes, emb_dim):
    """Deterministic synthetic class embeddings mimicking __init__:
    random (num_classes, emb_dim) -> L2 normalize along dim=1 -> transpose
    -> (emb_dim, num_classes), matching the torch Parameter layout."""
    emb = jax.random.normal(key, (num_classes, emb_dim), dtype=jnp.float32)
    norm = jnp.sqrt(jnp.sum(emb * emb, axis=1, keepdims=True))
    emb = emb / jnp.maximum(norm, 1e-12)
    return jnp.transpose(emb, (1, 0))  # (emb_dim, num_classes)


if __name__ == "__main__":
    key = jax.random.PRNGKey(0)
    k_emb, k_x = jax.random.split(key)

    B, C, H, W = 2, 32, 16, 16   # C = embedding dim ("channels" in the module)
    K = 8                        # number of classes

    class_emb_ck = make_class_emb(k_emb, K, C)          # (C, K) -- the torch Parameter
    class_emb_kc = jnp.transpose(class_emb_ck, (1, 0))  # (K, C) -- hoisted out of forward
    x = jax.random.normal(k_x, (B, C, H, W), dtype=jnp.float32)

    # f32 path: exact check against the same math as the torch matmul/permute forward.
    out = jax.block_until_ready(spnet_classifier_forward(x, class_emb_kc))
    ref = jnp.einsum("bchw,ck->bkhw", x, class_emb_ck)
    assert out.shape == (B, K, H, W)
    assert jnp.allclose(out, ref, atol=1e-5, rtol=1e-5)

    # bf16-in / bf16-out path (the recommended deployment mode for this HBM-bound
    # kernel; accumulation stays f32 inside the kernel).
    out_bf16 = jax.block_until_ready(
        spnet_classifier_forward(
            x.astype(jnp.bfloat16),
            class_emb_kc.astype(jnp.bfloat16),
            out_dtype=jnp.bfloat16,
        )
    )
    assert out_bf16.dtype == jnp.bfloat16
    assert jnp.allclose(out_bf16.astype(jnp.float32), ref, atol=1.5e-1, rtol=5e-2)

    print("KERNEL_OK")
</pallas_src>

<mosaic_0001>
module attributes {stable_mosaic.version = 11 : i64} {
  func.func @_proj_kernel(%arg0: i32, %arg1: i32, %arg2: memref<8x32xf32, #tpu.memory_space<vmem>>, %arg3: memref<2x32x256xf32, #tpu.memory_space<vmem>>, %arg4: memref<2x8x256xf32, #tpu.memory_space<vmem>>) attributes {dimension_semantics = [#tpu.dimension_semantics<parallel>, #tpu.dimension_semantics<parallel>], iteration_bounds = array<i64: 1, 1>, scalar_prefetch = 0 : i64, scratch_operands = 0 : i64, tpu.core_type = #tpu.core_type<tc>, window_params = [{pipeline_mode = #tpu.pipeline_mode<synchronous>, transform_indices = @transform_0, window_bounds = array<i64: 8, 32>}, {transform_indices = @transform_1, window_bounds = array<i64: 2, 32, 256>}, {transform_indices = @transform_2, window_bounds = array<i64: 2, 8, 256>}]} {
    %c0 = arith.constant 0 : index
    %c0_0 = arith.constant 0 : index
    %0 = vector.load %arg2[%c0, %c0_0] : memref<8x32xf32, #tpu.memory_space<vmem>>, vector<8x32xf32>
    %c0_1 = arith.constant 0 : index
    %c0_2 = arith.constant 0 : index
    %c0_3 = arith.constant 0 : index
    %1 = vector.load %arg3[%c0_1, %c0_2, %c0_3] : memref<2x32x256xf32, #tpu.memory_space<vmem>>, vector<1x32x256xf32>
    %2 = vector.shape_cast %1 : vector<1x32x256xf32> to vector<32x256xf32>
    %cst = arith.constant dense<0.000000e+00> : vector<8x256xf32>
    %3 = tpu.matmul %0, %2, %cst {dimension_numbers = #tpu.dot_dimension_numbers<[1], [0], [0], [1], [0, 0, 1, 1], [], []>} : vector<8x32xf32>, vector<32x256xf32>, vector<8x256xf32> -> vector<8x256xf32>
    %c0_4 = arith.constant 0 : index
    %c0_5 = arith.constant 0 : index
    %c0_6 = arith.constant 0 : index
    %4 = vector.load %arg4[%c0_4, %c0_5, %c0_6] : memref<2x8x256xf32, #tpu.memory_space<vmem>>, vector<1x8x256xf32>
    %5 = vector.shape_cast %4 : vector<1x8x256xf32> to vector<8x256xf32>
    %6 = vector.shape_cast %3 : vector<8x256xf32> to vector<1x8x256xf32>
    tpu.vector_store %arg4[%c0_4, %c0_5, %c0_6], %6 {strides = array<i32>} : memref<2x8x256xf32, #tpu.memory_space<vmem>>, vector<1x8x256xf32>,
    %c1 = arith.constant 1 : index
    %c0_7 = arith.constant 0 : index
    %c0_8 = arith.constant 0 : index
    %7 = vector.load %arg3[%c1, %c0_7, %c0_8] : memref<2x32x256xf32, #tpu.memory_space<vmem>>, vector<1x32x256xf32>
    %8 = vector.shape_cast %7 : vector<1x32x256xf32> to vector<32x256xf32>
    %cst_9 = arith.constant dense<0.000000e+00> : vector<8x256xf32>
    %9 = tpu.matmul %0, %8, %cst_9 {dimension_numbers = #tpu.dot_dimension_numbers<[1], [0], [0], [1], [0, 0, 1, 1], [], []>} : vector<8x32xf32>, vector<32x256xf32>, vector<8x256xf32> -> vector<8x256xf32>
    %c1_10 = arith.constant 1 : index
    %c0_11 = arith.constant 0 : index
    %c0_12 = arith.constant 0 : index
    %10 = vector.load %arg4[%c1_10, %c0_11, %c0_12] : memref<2x8x256xf32, #tpu.memory_space<vmem>>, vector<1x8x256xf32>
    %11 = vector.shape_cast %10 : vector<1x8x256xf32> to vector<8x256xf32>
    %12 = vector.shape_cast %9 : vector<8x256xf32> to vector<1x8x256xf32>
    tpu.vector_store %arg4[%c1_10, %c0_11, %c0_12], %12 {strides = array<i32>} : memref<2x8x256xf32, #tpu.memory_space<vmem>>, vector<1x8x256xf32>,
    return
  }
  func.func @transform_0(%arg0: i32, %arg1: i32) -> (i32, i32) {
    %c0_i32 = arith.constant 0 : i32
    %c0_i32_0 = arith.constant 0 : i32
    %c0_i32_1 = arith.constant 0 : i32
    return %c0_i32, %c0_i32_0 : i32, i32
  }
  func.func @transform_1(%arg0: i32, %arg1: i32) -> (i32, i32, i32) {
    %c0_i32 = arith.constant 0 : i32
    %c0_i32_0 = arith.constant 0 : i32
    return %arg0, %c0_i32, %arg1 : i32, i32, i32
  }
  func.func @transform_2(%arg0: i32, %arg1: i32) -> (i32, i32, i32) {
    %c0_i32 = arith.constant 0 : i32
    %c0_i32_0 = arith.constant 0 : i32
    return %arg0, %c0_i32, %arg1 : i32, i32, i32
  }
}

</mosaic_0001>

<bundles_post_ra>
// kernel: tpu_custom_call.1
= control target key start
LH: loop header
LB: loop body
LE: loop exit
PB: predicated region body
PF: predicated region fallthrough
CT: control target
= control target key end

     0   :  { %7 = vsyncpa [#allocation3], 0  ;;  %s391_s0 = inlined_call_operand.hbm [shape: f32[8,32], index: 0, kind: input, shape index: {}]   ;;  %s392_s1 = inlined_call_operand.hbm [shape: f32[2,32,256], index: 1, kind: input, shape index: {}]   ;;  %s393_s2 = inlined_call_operand.hbm [shape: f32[2,8,256], index: 2, kind: output, shape index: {}]  }
   0x1   :  { %8 = vsyncpa [#allocation6], 0 }
   0x2   :  { %9 = vsyncpa [#allocation4], 0  ;;  %s321_s9 = smov [#allocation2]   ;;  %s322_s11 = smov [#allocation5]  }
   0x3   :  { %s16_s10 = sshll.u32 %s321_s9, 4  ;;  %s25_s12 = sshll.u32 %s322_s11, 4  ;;  %s17_s10 = int_to_ptr.vmem [resolvable:$true] %s16_s10  ;;  %s342_s12 = int_to_ptr.vmem [resolvable:$true] %s25_s12 }
   0x4   :  { %s249_s15 = scalar_lea.hbm %s391_s0, 128 }
   0x5   :  { %p250_p0 = scmp.ne.s32.totalorder %s391_s0, %s249_s15  ;;  %p253_p1 = scmp.lt.u32.totalorder %s249_s15, %s391_s0 }
   0x7   :  { %p255_p2 = pnand %p253_p1, %p250_p0 }
   0x9   :  { %258 = shalt.err (!%p255_p2)
}
   0xa   :  { %s259_s20 = scalar_lea.vmem %s17_s10, 128  ;;  %p264_p4 = scmp.lt.s32.totalorder %s17_s10, %s17_s10 }
   0xb   :  { %p260_p3 = scmp.ne.s32.totalorder %s17_s10, %s259_s20  ;;  %p265_p5 = scmp.lt.s32.totalorder %s259_s20, %s259_s20 }
   0xd   :  { %p266_p6 = por %p265_p5, %p264_p4 }
   0xf   :  { %p267_p7 = pnand %p266_p6, %p260_p3 }
  0x11   :  { %270 = shalt.err (!%p267_p7)
}
  0x12   :  { %19 = dma.hbm_to_vmem [thread:$0]  %s391_s0, 128, %s17_s10, [#allocation3]  }
  0x13   :  { %s271_s25 = scalar_lea.hbm %s392_s1, 2048 }
  0x14   :  { %p272_p8 = scmp.ne.s32.totalorder %s392_s1, %s271_s25  ;;  %p275_p9 = scmp.lt.u32.totalorder %s271_s25, %s392_s1 }
  0x16   :  { %p277_p10 = pnand %p275_p9, %p272_p8 }
  0x18   :  { %280 = shalt.err (!%p277_p10)
}
  0x19   :  { %s281_s30 = scalar_lea.vmem %s342_s12, 2048  ;;  %p286_p12 = scmp.lt.s32.totalorder %s342_s12, %s342_s12 }
  0x1a   :  { %p282_p11 = scmp.ne.s32.totalorder %s342_s12, %s281_s30  ;;  %p287_p13 = scmp.lt.s32.totalorder %s281_s30, %s281_s30 }
  0x1c   :  { %p288_p0 = por %p287_p13, %p286_p12 }
  0x1e   :  { %p289_p1 = pnand %p288_p0, %p282_p11 }
  0x20   :  { %292 = shalt.err (!%p289_p1)
}
  0x21   :  { %s323_s0 = smov 256   ;;  %s324_s3 = smov 16  }
  0x22   :  { %31 = dma.hbm_to_vmem [thread:$0]  %s392_s1, 2048, %s342_s12, [#allocation6], %s323_s0, %s323_s0, %s324_s3  }
  0x23   :  { %315 = dma.done.wait [#allocation3], 128  }
  0x24   :  { %316 = vsyncadd [#allocation3], 4294967168 }
  0x25   :  { %317 = dma.done.wait [#allocation6], 2048  }
  0x26   :  { %318 = vsyncadd [#allocation6], 4294965248  ;;  %v325_v0 = vmov 0.0   ;;  %v40_v1 = vld [vmem:[#allocation5 + $0x8] sm:$0xff]  ;;  %v42_v2 = vld [vmem:[#allocation5 + $0x18] sm:$0xff]  ;;  %vm47_vm0 = vcmask 261120  }
  0x27   :  { %115 = vmatprep.mubr.f32.mxu0 %v325_v0  ;;  %197 = vmatprep.mubr.f32.mxu1 %v325_v0  ;;  %v126_v3 = vld [vmem:[#allocation5 + $0x48] sm:$0xff]  ;;  %v227_v4 = vpack.c.bf16 %v42_v2, %v40_v1  ;;  %v128_v5 = vld [vmem:[#allocation5 + $0x58] sm:$0xff]  ;;  %v39_v6 = vld [vmem:[#allocation5] sm:$0xff]  ;;  %s326_s1 = smov [#allocation7]  }
  0x28   :  { %v41_v7 = vld [vmem:[#allocation5 + $0x10] sm:$0xff]  ;;  %v235_v8 = vpack.c.bf16 %v128_v5, %v126_v3  ;;  %v125_v10 = vld [vmem:[#allocation5 + $0x40] sm:$0xff]  ;;  %v44_v12 = vld [vmem:[#allocation5 + $0x28] sm:$0xff]  ;;  %s212_s6 = sshll.u32 %s326_s1, 4  ;;  %s213_s6 = int_to_ptr.vmem [resolvable:$true] %s212_s6 }
  0x29   :  { %v229_v9 = vpack.c.bf16 %v41_v7, %v39_v6  ;;  %v127_v11 = vld [vmem:[#allocation5 + $0x50] sm:$0xff]  ;;  %228 = vmatprep.subr.bf16.mxu0 %v227_v4  ;;  %v46_v14 = vld [vmem:[#allocation5 + $0x38] sm:$0xff]  ;;  %v130_v15 = vld [vmem:[#allocation5 + $0x68] sm:$0xff]  ;;  %s293_s7 = scalar_lea.vmem %s213_s6, 512  ;;  %p298_p3 = scmp.lt.s32.totalorder %s213_s6, %s213_s6 }
  0x2a   :  { %v237_v13 = vpack.c.bf16 %v127_v11, %v125_v10  ;;  %v132_v16 = vld [vmem:[#allocation5 + $0x78] sm:$0xff]  ;;  %236 = vmatprep.subr.bf16.mxu1 %v235_v8  ;;  %v231_v17 = vpack.c.bf16 %v46_v14, %v44_v12  ;;  %v43_v19 = vld [vmem:[#allocation5 + $0x20] sm:$0xff]  ;;  %v45_v20 = vld [vmem:[#allocation5 + $0x30] sm:$0xff]  ;;  %p294_p2 = scmp.ne.s32.totalorder %s213_s6, %s293_s7  ;;  %p299_p4 = scmp.lt.s32.totalorder %s293_s7, %s293_s7 }
  0x2b   :  { %230 = vmatpush1.bf16.msra.mxu0 %v229_v9  ;;  %v239_v18 = vpack.c.bf16 %v132_v16, %v130_v15  ;;  %v129_v21 = vld [vmem:[#allocation5 + $0x60] sm:$0xff]  ;;  %v233_v22 = vpack.c.bf16 %v45_v20, %v43_v19  ;;  %v131_v23 = vld [vmem:[#allocation5 + $0x70] sm:$0xff]  ;;  %v38_v25 = vld [vmem:[#allocation2] sm:$0xff] }
  0x2c   :  { %238 = vmatpush1.bf16.msra.mxu1 %v237_v13  ;;  %232 = vmatprep.subr.bf16.mxu0 %v231_v17  ;;  %v241_v24 = vpack.c.bf16 %v131_v23, %v129_v21  ;;  %p300_p5 = por %p299_p4, %p298_p3 }
  0x2d   :  { %240 = vmatprep.subr.bf16.mxu1 %v239_v18 }
  0x2e   :  { %p301_p6 = pnand %p300_p5, %p294_p2 }
  0x2f   :  { %234 = vmatpush1.bf16.msra.mxu0 %v233_v22 }
  0x30   :  { %242 = vmatpush1.bf16.msra.mxu1 %v241_v24 }
  0x32   :  { %225 = vmatmul.mubr.msk.f32.vlgmr.msra.gmra.mrb[0].mxu0 %vm47_vm0, %v38_v25 }
  0x33   :  { %226 = vmatmul.mubr.msk.f32.vlgmr.msra.gmra.mrb[0].mxu1 %vm47_vm0, %v38_v25 }
 0x105   :  { %v117_v26 = vpop.f32.mrb[0].mxu0 }
 0x106   :  { %122 = vst [vmem:[#allocation7] sm:$0xff] %v117_v26  ;;  %v199_v27 = vpop.f32.mrb[0].mxu1  ;;  %v119_v28 = vpop.f32.mrb[1].mxu0 }
 0x107   :  { %205 = vst [vmem:[#allocation7 + $0x10] sm:$0xff] %v199_v27  ;;  %123 = vst [vmem:[#allocation7 + $0x8] sm:$0xff] %v119_v28  ;;  %v201_v29 = vpop.f32.mrb[1].mxu1 }
 0x108   :  { %206 = vst [vmem:[#allocation7 + $0x18] sm:$0xff] %v201_v29 }
 0x109   :  { %304 = shalt.err (!%p301_p6)
}
 0x10a   :  { %s305_s10 = scalar_lea.hbm %s393_s2, 512 }
 0x10b   :  { %p306_p7 = scmp.ne.s32.totalorder %s393_s2, %s305_s10  ;;  %p309_p8 = scmp.lt.u32.totalorder %s305_s10, %s393_s2 }
 0x10d   :  { %p311_p9 = pnand %p309_p8, %p306_p7 }
 0x10f   :  { %314 = shalt.err (!%p311_p9)
}
 0x110   :  { %218 = dma.vmem_to_hbm [thread:$0]  %s213_s6, 512, %s393_s2, [#allocation4], %s323_s0, %s323_s0, %s324_s3  }
 0x111   :  { %319 = dma.done.wait [#allocation4], 512  }
 0x112   :  { %320 = vsyncadd [#allocation4], 4294966784 }
 0x113   :  { %222 = vsyncpa [#allocation3], 1 }
 0x114   :  { %223 = vsyncpa [#allocation6], 1 }
 0x115   :  { %224 = vsyncpa [#allocation4], 1 }

</bundles_post_ra>
